<compile_context>
chip_gen: v7x
topology: tpu7x:2x2x1
jax: 0.10.0
libtpu: 0.0.40
codegen_flags: <defaults>
</compile_context>

<pallas_src>
import numpy as np
import jax
import jax.numpy as jnp
from jax.experimental import pallas as pl
from jax.experimental.pallas import tpu as pltpu

EPS = 1e-5  # PyTorch BatchNorm2d default eps

# (cin, cout, kernel, stride) — kernel == stride for every layer in the spec.
ENC_CFG = [(1, 3, 2, 2), (3, 4, 2, 2), (4, 8, 2, 2), (8, 16, 1, 1)]
DEC_CFG = [(16, 16, 1, 1), (16, 8, 2, 2), (8, 4, 2, 2), (4, 1, 2, 2)]
NUM_LAYERS = len(ENC_CFG) + len(DEC_CFG)

BLOCK = 1
for _ci, _co, _k, _s in ENC_CFG:
    BLOCK *= _s                      # total encoder downsample factor (= 8)
NC_IN = ENC_CFG[0][0]
NC_OUT = DEC_CFG[-1][1]


def _ru(x, m):
    return (x + m - 1) // m * m


def _pick_pack():
    """Patches packed per activation row. 2 -> 128 lanes (fits v5e 128x128
    MXU); 4 -> 256 lanes (fills the 256x256 MXU on v6e / v7x).  Any value is
    functionally correct on any chip; this is purely a perf knob."""
    try:
        kind = jax.devices()[0].device_kind.lower()
    except Exception:
        return 2
    if "v6" in kind or "v7" in kind:
        return 4
    return 2


PACK = _pick_pack()


# ----------------------------------------------------------------------------
# Offline preprocessing: fold im2col/col2im + BatchNorm(eval) into dense
# per-layer block-diagonal matrices, pad to a common (D, D) and stack.
# Runs once, off the forward path.
# ----------------------------------------------------------------------------
def _enc_big(w, hb, wb):
    """Conv2d weight (Cout, Cin, k, k), stride==k, acting on an (hb, wb, Cin)
    patch -> dense (hb*wb*Cin, ho*wo*Cout) matrix (valid because k==stride,
    i.e. non-overlapping windows)."""
    cout, cin, k, _ = w.shape
    ho, wo = hb // k, wb // k
    t = np.einsum('hH,wW,oikl->hkwliHWo',
                  np.eye(ho, dtype=np.float32),
                  np.eye(wo, dtype=np.float32),
                  np.asarray(w, np.float32))
    return t.reshape(hb * wb * cin, ho * wo * cout)


def _dec_big(w, hb, wb):
    """ConvTranspose2d weight (Cin, Cout, k, k), stride==k, acting on an
    (hb, wb, Cin) patch -> dense (hb*wb*Cin, hb*k*wb*k*Cout) matrix."""
    cin, cout, k, _ = w.shape
    t = np.einsum('hH,wW,ioKL->hwiHKWLo',
                  np.eye(hb, dtype=np.float32),
                  np.eye(wb, dtype=np.float32),
                  np.asarray(w, np.float32))
    return t.reshape(hb * wb * cin, hb * k * wb * k * cout)


def preprocess_params(params):
    """Returns (w_stack bf16 (L, D, D), b_stack f32 (L, 1, D)) with
    D = PACK * 64: PACK copies of each folded layer matrix on the diagonal so
    the kernel processes PACK patches per lane-dense row.  BatchNorm (general
    running stats) is folded into w/b."""
    mats, biases = [], []
    hb = wb = BLOCK

    def _fold(big_w, b, gamma, beta, mean, var, npos):
        scale = gamma / np.sqrt(var + EPS)
        shift = beta - mean * scale
        sb = np.tile(scale, npos)                  # per (pos, channel) column
        return big_w * sb[None, :], np.tile(b, npos) * sb + np.tile(shift, npos)

    for (cin, cout, k, s), (w, b, g, be, mu, var) in zip(ENC_CFG, params["enc"]):
        assert k == s, "patch folding requires kernel_size == stride"
        big = _enc_big(np.asarray(w), hb, wb)
        hb, wb = hb // k, wb // k
        bw, bb = _fold(big, np.asarray(b), np.asarray(g), np.asarray(be),
                       np.asarray(mu), np.asarray(var), hb * wb)
        mats.append(bw)
        biases.append(bb)

    for (cin, cout, k, s), (w, b, g, be, mu, var) in zip(DEC_CFG, params["dec"]):
        assert k == s, "patch folding requires kernel_size == stride"
        big = _dec_big(np.asarray(w), hb, wb)
        hb, wb = hb * k, wb * k
        bw, bb = _fold(big, np.asarray(b), np.asarray(g), np.asarray(be),
                       np.asarray(mu), np.asarray(var), hb * wb)
        mats.append(bw)
        biases.append(bb)

    d_base = _ru(max(max(m.shape) for m in mats), 8)     # 64 for this config
    D = d_base * PACK                                    # 128 / 256: lane-dense
    w_stack = np.zeros((NUM_LAYERS, D, D), np.float32)
    b_stack = np.zeros((NUM_LAYERS, 1, D), np.float32)
    for l, (m, bb) in enumerate(zip(mats, biases)):
        kk, nn = m.shape
        for p in range(PACK):                            # block-diagonal copies
            w_stack[l, p * d_base:p * d_base + kk, p * d_base:p * d_base + nn] = m
            b_stack[l, 0, p * d_base:p * d_base + nn] = bb
    # bf16 weights for the MXU; accumulation / bias / ReLU stay f32 in-kernel.
    return jnp.asarray(w_stack, jnp.bfloat16), jnp.asarray(b_stack, jnp.float32)


# ----------------------------------------------------------------------------
# The single fused Pallas kernel: 8 chained matmul+bias+ReLU layers, activation
# never leaves VMEM/vregs between layers.
# ----------------------------------------------------------------------------
def _gvgg_kernel(x_ref, w_ref, b_ref, o_ref):
    """x_ref: (tm, D) bf16 ; w_ref: (L, D, D) bf16 ; b_ref: (L, 1, D) f32."""
    h = x_ref[...]                                   # already bf16 (no cast)
    for l in range(NUM_LAYERS):                      # statically unrolled
        acc = jnp.dot(h, w_ref[l], preferred_element_type=jnp.float32)
        act = jnp.maximum(acc + b_ref[l], 0.0)       # BN already folded in w/b
        if l + 1 < NUM_LAYERS:
            h = act.astype(jnp.bfloat16)             # bf16 between layers
        else:
            o_ref[...] = act                         # final store in f32


@jax.jit
def gvgg_forward(x, w_stack, b_stack):
    """Eval-mode GVGG forward.  x: (N, NC_IN, H, W) f32 with H, W divisible by
    BLOCK (=8).  Returns (N, NC_OUT, H, W) f32."""
    N, C, H, W = x.shape
    assert C == NC_IN and H % BLOCK == 0 and W % BLOCK == 0
    D = w_stack.shape[1]
    d_base = D // PACK
    Hc, Wc = H // BLOCK, W // BLOCK

    # NCHW -> rows of 8x8 patches (fh, fw, ci), PACK patches per row — once.
    xb = (jnp.transpose(x, (0, 2, 3, 1))
            .reshape(N, Hc, BLOCK, Wc, BLOCK, C)
            .transpose(0, 1, 3, 2, 4, 5)
            .reshape(N * Hc * Wc, BLOCK * BLOCK * C))
    P, K = xb.shape
    if K < d_base:
        xb = jnp.pad(xb, ((0, 0), (0, d_base - K)))
    Pp = _ru(P, PACK)
    if Pp != P:
        xb = jnp.pad(xb, ((0, Pp - P), (0, 0)))
    M = Pp // PACK
    # bf16 input: halves HBM->VMEM traffic; kernel consumed bf16 anyway.
    xb = xb.reshape(M, D).astype(jnp.bfloat16)

    # Large row tiles amortize per-grid-step overhead; cap so the grid has
    # >= 2 blocks when possible ("parallel" axis shards across v7x's 2 cores).
    tm = max(8, min(512, _ru(max(M // 2, 1), 8)))
    Mp = _ru(M, tm)
    if Mp != M:
        xb = jnp.pad(xb, ((0, Mp - M), (0, 0)))

    out = pl.pallas_call(
        _gvgg_kernel,
        out_shape=jax.ShapeDtypeStruct((Mp, D), jnp.float32),
        grid_spec=pltpu.PrefetchScalarGridSpec(
            num_scalar_prefetch=0,
            grid=(Mp // tm,),
            in_specs=[
                pl.BlockSpec((tm, D), lambda i: (i, 0)),
                pl.BlockSpec((NUM_LAYERS, D, D), lambda i: (0, 0, 0)),
                pl.BlockSpec((NUM_LAYERS, 1, D), lambda i: (0, 0, 0)),
            ],
            out_specs=pl.BlockSpec((tm, D), lambda i: (i, 0)),
        ),
        compiler_params=pltpu.CompilerParams(
            dimension_semantics=("parallel",)),
    )(xb, w_stack, b_stack)

    # Unpack PACK patches per row, drop padding, back to NCHW — once.
    out = out[:M].reshape(M * PACK, d_base)[:P]
    ncols = BLOCK * BLOCK * NC_OUT
    if ncols < d_base:
        out = out[:, :ncols]
    y = (out.reshape(N, Hc, Wc, BLOCK, BLOCK, NC_OUT)
            .transpose(0, 1, 3, 2, 4, 5)
            .reshape(N, H, W, NC_OUT)
            .transpose(0, 3, 1, 2))
    return y


# ----------------------------------------------------------------------------
# Parameter init (mimics a freshly-initialized PyTorch GVGG; PyTorch layouts).
# ----------------------------------------------------------------------------
def init_params(key):
    params = {"enc": [], "dec": []}
    keys = jax.random.split(key, 4 * NUM_LAYERS)
    ki = 0

    def nxt():
        nonlocal ki
        k = keys[ki]
        ki += 1
        return k

    def bn(cout):
        gamma = 1.0 + 0.1 * jax.random.normal(nxt(), (cout,), jnp.float32)
        beta = 0.05 * jax.random.normal(nxt(), (cout,), jnp.float32)
        mean = jnp.zeros((cout,), jnp.float32)   # fresh running stats
        var = jnp.ones((cout,), jnp.float32)
        return gamma, beta, mean, var

    for cin, cout, k, s in ENC_CFG:
        w = 0.1 * jax.random.normal(nxt(), (cout, cin, k, k), jnp.float32)
        b = 0.05 * jax.random.normal(nxt(), (cout,), jnp.float32)
        params["enc"].append((w, b) + bn(cout))
    for cin, cout, k, s in DEC_CFG:
        w = 0.1 * jax.random.normal(nxt(), (cin, cout, k, k), jnp.float32)
        b = 0.05 * jax.random.normal(nxt(), (cout,), jnp.float32)
        params["dec"].append((w, b) + bn(cout))
    return params


if __name__ == "__main__":
    key = jax.random.PRNGKey(0)
    k_param, k_x = jax.random.split(key)

    params = init_params(k_param)
    w_stack, b_stack = preprocess_params(params)   # one-time, off the fwd path

    # small NCHW input; spatial must be divisible by 8 (three stride-2 stages)
    x = jax.random.normal(k_x, (2, 1, 16, 16), jnp.float32)

    out = gvgg_forward(x, w_stack, b_stack)
    out = jax.block_until_ready(out)

    assert out.shape == x.shape, f"unexpected output shape {out.shape}"
    assert bool(jnp.all(jnp.isfinite(out)))
    print("KERNEL_OK")
</pallas_src>

<mosaic_0001>
module attributes {stable_mosaic.version = 11 : i64} {
  func.func @_gvgg_kernel(%arg0: i32, %arg1: memref<8x128xbf16, #tpu.memory_space<vmem>>, %arg2: memref<8x128x128xbf16, #tpu.memory_space<vmem>>, %arg3: memref<8x1x128xf32, #tpu.memory_space<vmem>>, %arg4: memref<8x128xf32, #tpu.memory_space<vmem>>) attributes {dimension_semantics = [#tpu.dimension_semantics<parallel>], iteration_bounds = array<i64: 1>, scalar_prefetch = 0 : i64, scratch_operands = 0 : i64, tpu.core_type = #tpu.core_type<tc>, window_params = [{transform_indices = @transform_0, window_bounds = array<i64: 8, 128>}, {pipeline_mode = #tpu.pipeline_mode<synchronous>, transform_indices = @transform_1, window_bounds = array<i64: 8, 128, 128>}, {pipeline_mode = #tpu.pipeline_mode<synchronous>, transform_indices = @transform_2, window_bounds = array<i64: 8, 1, 128>}, {transform_indices = @transform_3, window_bounds = array<i64: 8, 128>}]} {
    %c0 = arith.constant 0 : index
    %c0_0 = arith.constant 0 : index
    %0 = vector.load %arg1[%c0, %c0_0] : memref<8x128xbf16, #tpu.memory_space<vmem>>, vector<8x128xbf16>
    %c0_1 = arith.constant 0 : index
    %c0_2 = arith.constant 0 : index
    %c0_3 = arith.constant 0 : index
    %1 = vector.load %arg2[%c0_1, %c0_2, %c0_3] : memref<8x128x128xbf16, #tpu.memory_space<vmem>>, vector<1x128x128xbf16>
    %2 = vector.shape_cast %1 : vector<1x128x128xbf16> to vector<128x128xbf16>
    %cst = arith.constant dense<0.000000e+00> : vector<8x128xf32>
    %3 = tpu.matmul %0, %2, %cst {dimension_numbers = #tpu.dot_dimension_numbers<[1], [0], [0], [1], [0, 0, 1, 1], [], []>} : vector<8x128xbf16>, vector<128x128xbf16>, vector<8x128xf32> -> vector<8x128xf32>
    %c0_4 = arith.constant 0 : index
    %c0_5 = arith.constant 0 : index
    %c0_6 = arith.constant 0 : index
    %4 = vector.load %arg3[%c0_4, %c0_5, %c0_6] : memref<8x1x128xf32, #tpu.memory_space<vmem>>, vector<1x1x128xf32>
    %5 = vector.shape_cast %4 : vector<1x1x128xf32> to vector<1x128xf32>
    %6 = vector.broadcast %5 : vector<1x128xf32> to vector<8x128xf32>
    %7 = arith.addf %3, %6 : vector<8x128xf32>
    %cst_7 = arith.constant 0.000000e+00 : f32
    %8 = vector.broadcast %cst_7 : f32 to vector<8x128xf32>
    %9 = arith.maximumf %7, %8 : vector<8x128xf32>
    %10 = arith.truncf %9 : vector<8x128xf32> to vector<8x128xbf16>
    %c1 = arith.constant 1 : index
    %c0_8 = arith.constant 0 : index
    %c0_9 = arith.constant 0 : index
    %11 = vector.load %arg2[%c1, %c0_8, %c0_9] : memref<8x128x128xbf16, #tpu.memory_space<vmem>>, vector<1x128x128xbf16>
    %12 = vector.shape_cast %11 : vector<1x128x128xbf16> to vector<128x128xbf16>
    %cst_10 = arith.constant dense<0.000000e+00> : vector<8x128xf32>
    %13 = tpu.matmul %10, %12, %cst_10 {dimension_numbers = #tpu.dot_dimension_numbers<[1], [0], [0], [1], [0, 0, 1, 1], [], []>} : vector<8x128xbf16>, vector<128x128xbf16>, vector<8x128xf32> -> vector<8x128xf32>
    %c1_11 = arith.constant 1 : index
    %c0_12 = arith.constant 0 : index
    %c0_13 = arith.constant 0 : index
    %14 = vector.load %arg3[%c1_11, %c0_12, %c0_13] : memref<8x1x128xf32, #tpu.memory_space<vmem>>, vector<1x1x128xf32>
    %15 = vector.shape_cast %14 : vector<1x1x128xf32> to vector<1x128xf32>
    %16 = vector.broadcast %15 : vector<1x128xf32> to vector<8x128xf32>
    %17 = arith.addf %13, %16 : vector<8x128xf32>
    %cst_14 = arith.constant 0.000000e+00 : f32
    %18 = vector.broadcast %cst_14 : f32 to vector<8x128xf32>
    %19 = arith.maximumf %17, %18 : vector<8x128xf32>
    %20 = arith.truncf %19 : vector<8x128xf32> to vector<8x128xbf16>
    %c2 = arith.constant 2 : index
    %c0_15 = arith.constant 0 : index
    %c0_16 = arith.constant 0 : index
    %21 = vector.load %arg2[%c2, %c0_15, %c0_16] : memref<8x128x128xbf16, #tpu.memory_space<vmem>>, vector<1x128x128xbf16>
    %22 = vector.shape_cast %21 : vector<1x128x128xbf16> to vector<128x128xbf16>
    %cst_17 = arith.constant dense<0.000000e+00> : vector<8x128xf32>
    %23 = tpu.matmul %20, %22, %cst_17 {dimension_numbers = #tpu.dot_dimension_numbers<[1], [0], [0], [1], [0, 0, 1, 1], [], []>} : vector<8x128xbf16>, vector<128x128xbf16>, vector<8x128xf32> -> vector<8x128xf32>
    %c2_18 = arith.constant 2 : index
    %c0_19 = arith.constant 0 : index
    %c0_20 = arith.constant 0 : index
    %24 = vector.load %arg3[%c2_18, %c0_19, %c0_20] : memref<8x1x128xf32, #tpu.memory_space<vmem>>, vector<1x1x128xf32>
    %25 = vector.shape_cast %24 : vector<1x1x128xf32> to vector<1x128xf32>
    %26 = vector.broadcast %25 : vector<1x128xf32> to vector<8x128xf32>
    %27 = arith.addf %23, %26 : vector<8x128xf32>
    %cst_21 = arith.constant 0.000000e+00 : f32
    %28 = vector.broadcast %cst_21 : f32 to vector<8x128xf32>
    %29 = arith.maximumf %27, %28 : vector<8x128xf32>
    %30 = arith.truncf %29 : vector<8x128xf32> to vector<8x128xbf16>
    %c3 = arith.constant 3 : index
    %c0_22 = arith.constant 0 : index
    %c0_23 = arith.constant 0 : index
    %31 = vector.load %arg2[%c3, %c0_22, %c0_23] : memref<8x128x128xbf16, #tpu.memory_space<vmem>>, vector<1x128x128xbf16>
    %32 = vector.shape_cast %31 : vector<1x128x128xbf16> to vector<128x128xbf16>
    %cst_24 = arith.constant dense<0.000000e+00> : vector<8x128xf32>
    %33 = tpu.matmul %30, %32, %cst_24 {dimension_numbers = #tpu.dot_dimension_numbers<[1], [0], [0], [1], [0, 0, 1, 1], [], []>} : vector<8x128xbf16>, vector<128x128xbf16>, vector<8x128xf32> -> vector<8x128xf32>
    %c3_25 = arith.constant 3 : index
    %c0_26 = arith.constant 0 : index
    %c0_27 = arith.constant 0 : index
    %34 = vector.load %arg3[%c3_25, %c0_26, %c0_27] : memref<8x1x128xf32, #tpu.memory_space<vmem>>, vector<1x1x128xf32>
    %35 = vector.shape_cast %34 : vector<1x1x128xf32> to vector<1x128xf32>
    %36 = vector.broadcast %35 : vector<1x128xf32> to vector<8x128xf32>
    %37 = arith.addf %33, %36 : vector<8x128xf32>
    %cst_28 = arith.constant 0.000000e+00 : f32
    %38 = vector.broadcast %cst_28 : f32 to vector<8x128xf32>
    %39 = arith.maximumf %37, %38 : vector<8x128xf32>
    %40 = arith.truncf %39 : vector<8x128xf32> to vector<8x128xbf16>
    %c4 = arith.constant 4 : index
    %c0_29 = arith.constant 0 : index
    %c0_30 = arith.constant 0 : index
    %41 = vector.load %arg2[%c4, %c0_29, %c0_30] : memref<8x128x128xbf16, #tpu.memory_space<vmem>>, vector<1x128x128xbf16>
    %42 = vector.shape_cast %41 : vector<1x128x128xbf16> to vector<128x128xbf16>
    %cst_31 = arith.constant dense<0.000000e+00> : vector<8x128xf32>
    %43 = tpu.matmul %40, %42, %cst_31 {dimension_numbers = #tpu.dot_dimension_numbers<[1], [0], [0], [1], [0, 0, 1, 1], [], []>} : vector<8x128xbf16>, vector<128x128xbf16>, vector<8x128xf32> -> vector<8x128xf32>
    %c4_32 = arith.constant 4 : index
    %c0_33 = arith.constant 0 : index
    %c0_34 = arith.constant 0 : index
    %44 = vector.load %arg3[%c4_32, %c0_33, %c0_34] : memref<8x1x128xf32, #tpu.memory_space<vmem>>, vector<1x1x128xf32>
    %45 = vector.shape_cast %44 : vector<1x1x128xf32> to vector<1x128xf32>
    %46 = vector.broadcast %45 : vector<1x128xf32> to vector<8x128xf32>
    %47 = arith.addf %43, %46 : vector<8x128xf32>
    %cst_35 = arith.constant 0.000000e+00 : f32
    %48 = vector.broadcast %cst_35 : f32 to vector<8x128xf32>
    %49 = arith.maximumf %47, %48 : vector<8x128xf32>
    %50 = arith.truncf %49 : vector<8x128xf32> to vector<8x128xbf16>
    %c5 = arith.constant 5 : index
    %c0_36 = arith.constant 0 : index
    %c0_37 = arith.constant 0 : index
    %51 = vector.load %arg2[%c5, %c0_36, %c0_37] : memref<8x128x128xbf16, #tpu.memory_space<vmem>>, vector<1x128x128xbf16>
    %52 = vector.shape_cast %51 : vector<1x128x128xbf16> to vector<128x128xbf16>
    %cst_38 = arith.constant dense<0.000000e+00> : vector<8x128xf32>
    %53 = tpu.matmul %50, %52, %cst_38 {dimension_numbers = #tpu.dot_dimension_numbers<[1], [0], [0], [1], [0, 0, 1, 1], [], []>} : vector<8x128xbf16>, vector<128x128xbf16>, vector<8x128xf32> -> vector<8x128xf32>
    %c5_39 = arith.constant 5 : index
    %c0_40 = arith.constant 0 : index
    %c0_41 = arith.constant 0 : index
    %54 = vector.load %arg3[%c5_39, %c0_40, %c0_41] : memref<8x1x128xf32, #tpu.memory_space<vmem>>, vector<1x1x128xf32>
    %55 = vector.shape_cast %54 : vector<1x1x128xf32> to vector<1x128xf32>
    %56 = vector.broadcast %55 : vector<1x128xf32> to vector<8x128xf32>
    %57 = arith.addf %53, %56 : vector<8x128xf32>
    %cst_42 = arith.constant 0.000000e+00 : f32
    %58 = vector.broadcast %cst_42 : f32 to vector<8x128xf32>
    %59 = arith.maximumf %57, %58 : vector<8x128xf32>
    %60 = arith.truncf %59 : vector<8x128xf32> to vector<8x128xbf16>
    %c6 = arith.constant 6 : index
    %c0_43 = arith.constant 0 : index
    %c0_44 = arith.constant 0 : index
    %61 = vector.load %arg2[%c6, %c0_43, %c0_44] : memref<8x128x128xbf16, #tpu.memory_space<vmem>>, vector<1x128x128xbf16>
    %62 = vector.shape_cast %61 : vector<1x128x128xbf16> to vector<128x128xbf16>
    %cst_45 = arith.constant dense<0.000000e+00> : vector<8x128xf32>
    %63 = tpu.matmul %60, %62, %cst_45 {dimension_numbers = #tpu.dot_dimension_numbers<[1], [0], [0], [1], [0, 0, 1, 1], [], []>} : vector<8x128xbf16>, vector<128x128xbf16>, vector<8x128xf32> -> vector<8x128xf32>
    %c6_46 = arith.constant 6 : index
    %c0_47 = arith.constant 0 : index
    %c0_48 = arith.constant 0 : index
    %64 = vector.load %arg3[%c6_46, %c0_47, %c0_48] : memref<8x1x128xf32, #tpu.memory_space<vmem>>, vector<1x1x128xf32>
    %65 = vector.shape_cast %64 : vector<1x1x128xf32> to vector<1x128xf32>
    %66 = vector.broadcast %65 : vector<1x128xf32> to vector<8x128xf32>
    %67 = arith.addf %63, %66 : vector<8x128xf32>
    %cst_49 = arith.constant 0.000000e+00 : f32
    %68 = vector.broadcast %cst_49 : f32 to vector<8x128xf32>
    %69 = arith.maximumf %67, %68 : vector<8x128xf32>
    %70 = arith.truncf %69 : vector<8x128xf32> to vector<8x128xbf16>
    %c7 = arith.constant 7 : index
    %c0_50 = arith.constant 0 : index
    %c0_51 = arith.constant 0 : index
    %71 = vector.load %arg2[%c7, %c0_50, %c0_51] : memref<8x128x128xbf16, #tpu.memory_space<vmem>>, vector<1x128x128xbf16>
    %72 = vector.shape_cast %71 : vector<1x128x128xbf16> to vector<128x128xbf16>
    %cst_52 = arith.constant dense<0.000000e+00> : vector<8x128xf32>
    %73 = tpu.matmul %70, %72, %cst_52 {dimension_numbers = #tpu.dot_dimension_numbers<[1], [0], [0], [1], [0, 0, 1, 1], [], []>} : vector<8x128xbf16>, vector<128x128xbf16>, vector<8x128xf32> -> vector<8x128xf32>
    %c7_53 = arith.constant 7 : index
    %c0_54 = arith.constant 0 : index
    %c0_55 = arith.constant 0 : index
    %74 = vector.load %arg3[%c7_53, %c0_54, %c0_55] : memref<8x1x128xf32, #tpu.memory_space<vmem>>, vector<1x1x128xf32>
    %75 = vector.shape_cast %74 : vector<1x1x128xf32> to vector<1x128xf32>
    %76 = vector.broadcast %75 : vector<1x128xf32> to vector<8x128xf32>
    %77 = arith.addf %73, %76 : vector<8x128xf32>
    %cst_56 = arith.constant 0.000000e+00 : f32
    %78 = vector.broadcast %cst_56 : f32 to vector<8x128xf32>
    %79 = arith.maximumf %77, %78 : vector<8x128xf32>
    %c0_57 = arith.constant 0 : index
    %c0_58 = arith.constant 0 : index
    %80 = vector.load %arg4[%c0_57, %c0_58] : memref<8x128xf32, #tpu.memory_space<vmem>>, vector<8x128xf32>
    tpu.vector_store %arg4[%c0_57, %c0_58], %79 {strides = array<i32>} : memref<8x128xf32, #tpu.memory_space<vmem>>, vector<8x128xf32>,
    return
  }
  func.func @transform_0(%arg0: i32) -> (i32, i32) {
    %c0_i32 = arith.constant 0 : i32
    %c0_i32_0 = arith.constant 0 : i32
    return %arg0, %c0_i32 : i32, i32
  }
  func.func @transform_1(%arg0: i32) -> (i32, i32, i32) {
    %c0_i32 = arith.constant 0 : i32
    %c0_i32_0 = arith.constant 0 : i32
    %c0_i32_1 = arith.constant 0 : i32
    %c0_i32_2 = arith.constant 0 : i32
    return %c0_i32, %c0_i32_0, %c0_i32_1 : i32, i32, i32
  }
  func.func @transform_2(%arg0: i32) -> (i32, i32, i32) {
    %c0_i32 = arith.constant 0 : i32
    %c0_i32_0 = arith.constant 0 : i32
    %c0_i32_1 = arith.constant 0 : i32
    %c0_i32_2 = arith.constant 0 : i32
    return %c0_i32, %c0_i32_0, %c0_i32_1 : i32, i32, i32
  }
  func.func @transform_3(%arg0: i32) -> (i32, i32) {
    %c0_i32 = arith.constant 0 : i32
    %c0_i32_0 = arith.constant 0 : i32
    return %arg0, %c0_i32 : i32, i32
  }
}

</mosaic_0001>

<bundles_post_ra>
// kernel: gvgg_forward.1
= control target key start
LH: loop header
LB: loop body
LE: loop exit
PB: predicated region body
PF: predicated region fallthrough
CT: control target
= control target key end

     0   :  { %8 = vsyncpa [#allocation3], 0  ;;  %s1357_s12 = smov [#allocation2]   ;;  %s1504_s0 = inlined_call_operand.vmem [shape: bf16[8,128], index: 0, kind: input, shape index: {}]   ;;  %s1505_s1 = inlined_call_operand.hbm [shape: bf16[8,128,128], index: 1, kind: input, shape index: {}]   ;;  %s1506_s2 = inlined_call_operand.vmem [shape: f32[8,1,128], index: 2, kind: input, shape index: {}]   ;;  %s1507_s3 = inlined_call_operand.vmem [shape: f32[8,128], index: 3, kind: output, shape index: {}]  }
   0x1   :  { %s16_s13 = sshll.u32 %s1357_s12, 4  ;;  %s1333_s16 = scalar_lea.hbm %s1505_s1, 8192  ;;  %s17_s13 = int_to_ptr.vmem [resolvable:$true] %s16_s13 }
   0x2   :  { %p1334_p0 = scmp.ne.s32.totalorder %s1505_s1, %s1333_s16  ;;  %p1337_p1 = scmp.lt.u32.totalorder %s1333_s16, %s1505_s1 }
   0x4   :  { %p1339_p2 = pnand %p1337_p1, %p1334_p0 }
   0x6   :  { %1342 = shalt.err (!%p1339_p2)
}
   0x7   :  { %s1343_s21 = scalar_lea.vmem %s17_s13, 8192  ;;  %p1348_p4 = scmp.lt.s32.totalorder %s17_s13, %s17_s13 }
   0x8   :  { %p1344_p3 = scmp.ne.s32.totalorder %s17_s13, %s1343_s21  ;;  %p1349_p5 = scmp.lt.s32.totalorder %s1343_s21, %s1343_s21 }
   0xa   :  { %p1350_p6 = por %p1349_p5, %p1348_p4 }
   0xc   :  { %p1351_p7 = pnand %p1350_p6, %p1344_p3 }
   0xe   :  { %1354 = shalt.err (!%p1351_p7)
}
   0xf   :  { %s1358_s22 = smov 64   ;;  %s1359_s23 = smov 4  }
  0x10   :  { %22 = dma.hbm_to_vmem [thread:$0]  %s1505_s1, 8192, %s17_s13, [#allocation3], %s1358_s22, %s1358_s22, %s1359_s23  }
  0x11   :  { %1355 = dma.done.wait [#allocation3], 8192  }
  0x12   :  { %1356 = vsyncadd [#allocation3], 4294959104  ;;  %v1360_v0 = vmov 0.0   ;;  %vm1361_vm0 = vmmov 0   ;;  %v1269_v1 = vld [vmem:[#allocation2] sm:$0xff]   ;;  %v1270_v2 = vld [vmem:[#allocation2 + $0x8] sm:$0xff]  }
  0x13   :  { %1104 = vmatprep.subr.bf16.mxu0 %v1360_v0  ;;  %1120 = vmatprep.mubr.msk.bf16.mxu0 %vm1361_vm0, %v1360_v0  ;;  %v1271_v3 = vld [vmem:[#allocation2 + $0x10] sm:$0xff]   ;;  %v1277_v4 = vld [vmem:[#allocation2 + $0x40] sm:$0xff]   ;;  %v1272_v5 = vld [vmem:[#allocation2 + $0x18] sm:$0xff]  }
  0x14   :  { %1124 = vmatprep.subr.bf16.mxu1 %v1360_v0  ;;  %1140 = vmatprep.mubr.msk.bf16.mxu1 %vm1361_vm0, %v1360_v0  ;;  %v1278_v6 = vld [vmem:[#allocation2 + $0x48] sm:$0xff]   ;;  %v1273_v7 = vld [vmem:[#allocation2 + $0x20] sm:$0xff]   ;;  %v1279_v8 = vld [vmem:[#allocation2 + $0x50] sm:$0xff]  }
  0x15   :  { %1105 = vmatpush3.bf16.msra.mxu0 %v1269_v1  ;;  %1125 = vmatpush3.bf16.msra.mxu1 %v1277_v4  ;;  %v1274_v9 = vld [vmem:[#allocation2 + $0x28] sm:$0xff]   ;;  %v1280_v10 = vld [vmem:[#allocation2 + $0x58] sm:$0xff]   ;;  %v1275_v11 = vld [vmem:[#allocation2 + $0x30] sm:$0xff]  }
  0x16   :  { %1106 = vmatprep.subr.bf16.mxu0 %v1360_v0  ;;  %1126 = vmatprep.subr.bf16.mxu1 %v1360_v0  ;;  %v1281_v12 = vld [vmem:[#allocation2 + $0x60] sm:$0xff]   ;;  %v1276_v13 = vld [vmem:[#allocation2 + $0x38] sm:$0xff]   ;;  %v1282_v14 = vld [vmem:[#allocation2 + $0x68] sm:$0xff]  }
  0x17   :  { %v29_v15 = vld [vmem:[%s1504_s0] sm:$0xf]  ;;  %v1283_v16 = vld [vmem:[#allocation2 + $0x70] sm:$0xff]   ;;  %v1284_v17 = vld [vmem:[#allocation2 + $0x78] sm:$0xff]  }
  0x18   :  { %v1285_v18 = vld [vmem:[#allocation2 + $0x80] sm:$0xff]   ;;  %v1286_v19 = vld [vmem:[#allocation2 + $0x88] sm:$0xff]   ;;  %v1287_v20 = vld [vmem:[#allocation2 + $0x90] sm:$0xff]  }
  0x19   :  { %1107 = vmatpush3.bf16.msra.mxu0 %v1270_v2  ;;  %1127 = vmatpush3.bf16.msra.mxu1 %v1278_v6  ;;  %v1288_v21 = vld [vmem:[#allocation2 + $0x98] sm:$0xff]   ;;  %v1289_v22 = vld [vmem:[#allocation2 + $0xa0] sm:$0xff]   ;;  %v1290_v23 = vld [vmem:[#allocation2 + $0xa8] sm:$0xff]  }
  0x1a   :  { %1108 = vmatprep.subr.bf16.mxu0 %v1360_v0  ;;  %1128 = vmatprep.subr.bf16.mxu1 %v1360_v0  ;;  %v953_v24 = vld [vmem:[%s1506_s2] ss:$0 sm:$0xff]  ;;  %v1291_v32 = vld [vmem:[#allocation2 + $0xb0] sm:$0xff]   ;;  %v1292_v33 = vld [vmem:[#allocation2 + $0xb8] sm:$0xff]  }
  0x1b   :  { %v1293_v34 = vld [vmem:[#allocation2 + $0xc0] sm:$0xff]   ;;  %v1294_v35 = vld [vmem:[#allocation2 + $0xc8] sm:$0xff]   ;;  %v1295_v36 = vld [vmem:[#allocation2 + $0xd0] sm:$0xff]  }
  0x1c   :  { %v1296_v37 = vld [vmem:[#allocation2 + $0xd8] sm:$0xff]   ;;  %v1297_v38 = vld [vmem:[#allocation2 + $0xe0] sm:$0xff]   ;;  %v1298_v39 = vld [vmem:[#allocation2 + $0xe8] sm:$0xff]  }
  0x1d   :  { %1109 = vmatpush3.bf16.msra.mxu0 %v1271_v3  ;;  %1129 = vmatpush3.bf16.msra.mxu1 %v1279_v8  ;;  %v963_v40 = vld [vmem:[%s1506_s2 + $0x1] ss:$0 sm:$0xff]  ;;  %v1299_v48 = vld [vmem:[#allocation2 + $0xf0] sm:$0xff]   ;;  %v1300_v49 = vld [vmem:[#allocation2 + $0xf8] sm:$0xff]  }
  0x1e   :  { %1110 = vmatprep.subr.bf16.mxu0 %v1360_v0  ;;  %1130 = vmatprep.subr.bf16.mxu1 %v1360_v0  ;;  %v1301_v50 = vld [vmem:[#allocation2 + $0x100] sm:$0xff]   ;;  %v1302_v51 = vld [vmem:[#allocation2 + $0x108] sm:$0xff]   ;;  %v1303_v52 = vld [vmem:[#allocation2 + $0x110] sm:$0xff]  }
  0x1f   :  { %v1304_v53 = vld [vmem:[#allocation2 + $0x118] sm:$0xff]   ;;  %v1305_v54 = vld [vmem:[#allocation2 + $0x120] sm:$0xff]   ;;  %v1306_v55 = vld [vmem:[#allocation2 + $0x128] sm:$0xff]  }
  0x20   :  { %v973_v56 = vld [vmem:[%s1506_s2 + $0x2] ss:$0 sm:$0xff]  ;;  %v1307_v1 = vld [vmem:[#allocation2 + $0x130] sm:$0xff]   ;;  %v1308_v2 = vld [vmem:[#allocation2 + $0x138] sm:$0xff]  }
  0x21   :  { %1111 = vmatpush3.bf16.msra.mxu0 %v1272_v5  ;;  %1131 = vmatpush3.bf16.msra.mxu1 %v1280_v10  ;;  %v1309_v3 = vld [vmem:[#allocation2 + $0x140] sm:$0xff]   ;;  %v1310_v4 = vld [vmem:[#allocation2 + $0x148] sm:$0xff]   ;;  %v1311_v5 = vld [vmem:[#allocation2 + $0x150] sm:$0xff]  }
  0x22   :  { %1112 = vmatprep.subr.bf16.mxu0 %v1360_v0  ;;  %1132 = vmatprep.subr.bf16.mxu1 %v1360_v0  ;;  %v1312_v6 = vld [vmem:[#allocation2 + $0x158] sm:$0xff]   ;;  %v1314_v8 = vld [vmem:[#allocation2 + $0x168] sm:$0xff]  }
  0x25   :  { %1113 = vmatpush3.bf16.msra.mxu0 %v1273_v7  ;;  %1133 = vmatpush3.bf16.msra.mxu1 %v1281_v12  ;;  %v1313_v7 = vld [vmem:[#allocation2 + $0x160] sm:$0xff]  }
  0x26   :  { %1114 = vmatprep.subr.bf16.mxu0 %v1360_v0  ;;  %1134 = vmatprep.subr.bf16.mxu1 %v1360_v0 }
  0x29   :  { %1115 = vmatpush3.bf16.msra.mxu0 %v1274_v9  ;;  %1135 = vmatpush3.bf16.msra.mxu1 %v1282_v14  ;;  %v983_v9 = vld [vmem:[%s1506_s2 + $0x3] ss:$0 sm:$0xff] }
  0x2a   :  { %1116 = vmatprep.subr.bf16.mxu0 %v1360_v0  ;;  %1136 = vmatprep.subr.bf16.mxu1 %v1360_v0 }
  0x2d   :  { %1117 = vmatpush3.bf16.msra.mxu0 %v1275_v11  ;;  %1137 = vmatpush3.bf16.msra.mxu1 %v1283_v16 }
  0x2e   :  { %1118 = vmatprep.subr.bf16.mxu0 %v1360_v0  ;;  %1138 = vmatprep.subr.bf16.mxu1 %v1360_v0 }
  0x31   :  { %1119 = vmatpush3.bf16.msra.mxu0 %v1276_v13  ;;  %1139 = vmatpush3.bf16.msra.mxu1 %v1284_v17  ;;  %v1315_v17 = vld [vmem:[#allocation2 + $0x170] sm:$0xff]  }
  0x32   :  { %1144 = vmatprep.subr.bf16.mxu0 %v1360_v0  ;;  %1164 = vmatprep.subr.bf16.mxu1 %v1360_v0 }
  0x34   :  { %1121 = vmatmul.mubr.bf16.vlgmr.msra.gmra.mrb[0].mxu0 %v29_v15 }
  0x35   :  { %1160 = vmatprep.mubr.msk.bf16.mxu0 %vm1361_vm0, %v1360_v0  ;;  %1145 = vmatpush3.bf16.msra.mxu0 %v1285_v18  ;;  %v1316_v18 = vld [vmem:[#allocation2 + $0x178] sm:$0xff]  }
  0x36   :  { %1146 = vmatprep.subr.bf16.mxu0 %v1360_v0 }
  0x39   :  { %1147 = vmatpush3.bf16.msra.mxu0 %v1286_v19  ;;  %v1317_v19 = vld [vmem:[#allocation2 + $0x180] sm:$0xff]  }
  0x3a   :  { %1148 = vmatprep.subr.bf16.mxu0 %v1360_v0 }
  0x3d   :  { %1149 = vmatpush3.bf16.msra.mxu0 %v1287_v20  ;;  %v1318_v20 = vld [vmem:[#allocation2 + $0x188] sm:$0xff]  }
  0x3e   :  { %1150 = vmatprep.subr.bf16.mxu0 %v1360_v0 }
  0x41   :  { %1151 = vmatpush3.bf16.msra.mxu0 %v1288_v21  ;;  %v1319_v21 = vld [vmem:[#allocation2 + $0x190] sm:$0xff]  }
  0x42   :  { %1152 = vmatprep.subr.bf16.mxu0 %v1360_v0 }
  0x45   :  { %1153 = vmatpush3.bf16.msra.mxu0 %v1289_v22  ;;  %v1320_v22 = vld [vmem:[#allocation2 + $0x198] sm:$0xff]  }
  0x46   :  { %1154 = vmatprep.subr.bf16.mxu0 %v1360_v0 }
  0x49   :  { %1155 = vmatpush3.bf16.msra.mxu0 %v1290_v23  ;;  %v1321_v23 = vld [vmem:[#allocation2 + $0x1a0] sm:$0xff]  }
  0x4a   :  { %1156 = vmatprep.subr.bf16.mxu0 %v1360_v0 }
  0x4d   :  { %1157 = vmatpush3.bf16.msra.mxu0 %v1291_v32 }
  0x4e   :  { %1158 = vmatprep.subr.bf16.mxu0 %v1360_v0 }
  0x51   :  { %1159 = vmatpush3.bf16.msra.mxu0 %v1292_v33  ;;  %v1323_v33 = vld [vmem:[#allocation2 + $0x1b0] sm:$0xff]  }
  0x52   :  { %1184 = vmatprep.subr.bf16.mxu0 %v1360_v0 }
 0x107   :  { %v135_v25 = vpop.f32.mrb[0].mxu0 }
 0x108   :  { %v136_v26 = vadd.f32 %v953_v24, %v135_v25  ;;  %v1122_v27 = vpop.f32.mrb[1].mxu0  ;;  %v1322_v24 = vld [vmem:[#allocation2 + $0x1a8] sm:$0xff]   ;;  %v993_v25 = vld [vmem:[%s1506_s2 + $0x4] ss:$0 sm:$0xff] }
 0x109   :  { %v138_v28 = vpop.f32.mrb[2].mxu0 }
 0x10a   :  { %v141_v29 = vmax.f32 %v136_v26, 0.0  ;;  %v1123_v30 = vpop.f32.mrb[3].mxu0 }
 0x10c   :  { %v142_v31 = vpack.c.bf16 %v141_v29, %v141_v29 }
 0x10e   :  { %1141 = vmatmul.mubr.bf16.vlgmr.msra.gmra.mrb[0].mxu1 %v142_v31 }
 0x10f   :  { %1180 = vmatprep.mubr.msk.bf16.mxu1 %vm1361_vm0, %v1360_v0  ;;  %1165 = vmatpush3.bf16.msra.mxu1 %v1293_v34  ;;  %v1324_v34 = vld [vmem:[#allocation2 + $0x1b8] sm:$0xff]  }
 0x110   :  { %1166 = vmatprep.subr.bf16.mxu1 %v1360_v0 }
 0x113   :  { %1167 = vmatpush3.bf16.msra.mxu1 %v1294_v35  ;;  %v1325_v35 = vld [vmem:[#allocation2 + $0x1c0] sm:$0xff]  }
 0x114   :  { %1168 = vmatprep.subr.bf16.mxu1 %v1360_v0 }
 0x117   :  { %1169 = vmatpush3.bf16.msra.mxu1 %v1295_v36  ;;  %v1326_v36 = vld [vmem:[#allocation2 + $0x1c8] sm:$0xff]  }
 0x118   :  { %1170 = vmatprep.subr.bf16.mxu1 %v1360_v0 }
 0x11b   :  { %1171 = vmatpush3.bf16.msra.mxu1 %v1296_v37  ;;  %v1327_v37 = vld [vmem:[#allocation2 + $0x1d0] sm:$0xff]  }
 0x11c   :  { %1172 = vmatprep.subr.bf16.mxu1 %v1360_v0 }
 0x11f   :  { %1173 = vmatpush3.bf16.msra.mxu1 %v1297_v38  ;;  %v1328_v38 = vld [vmem:[#allocation2 + $0x1d8] sm:$0xff]  }
 0x120   :  { %1174 = vmatprep.subr.bf16.mxu1 %v1360_v0 }
 0x123   :  { %1175 = vmatpush3.bf16.msra.mxu1 %v1298_v39  ;;  %v1329_v39 = vld [vmem:[#allocation2 + $0x1e0] sm:$0xff]  }
 0x124   :  { %1176 = vmatprep.subr.bf16.mxu1 %v1360_v0 }
 0x127   :  { %1177 = vmatpush3.bf16.msra.mxu1 %v1299_v48 }
 0x128   :  { %1178 = vmatprep.subr.bf16.mxu1 %v1360_v0 }
 0x12b   :  { %1179 = vmatpush3.bf16.msra.mxu1 %v1300_v49  ;;  %v1331_v49 = vld [vmem:[#allocation2 + $0x1f0] sm:$0xff]  }
 0x12c   :  { %1204 = vmatprep.subr.bf16.mxu1 %v1360_v0 }
 0x1e1   :  { %v250_v41 = vpop.f32.mrb[0].mxu1 }
 0x1e2   :  { %v251_v42 = vadd.f32 %v963_v40, %v250_v41  ;;  %v1142_v43 = vpop.f32.mrb[1].mxu1  ;;  %v1330_v40 = vld [vmem:[#allocation2 + $0x1e8] sm:$0xff]   ;;  %v1003_v41 = vld [vmem:[%s1506_s2 + $0x5] ss:$0 sm:$0xff] }
 0x1e3   :  { %v253_v44 = vpop.f32.mrb[2].mxu1 }
 0x1e4   :  { %v256_v45 = vmax.f32 %v251_v42, 0.0  ;;  %v1143_v46 = vpop.f32.mrb[3].mxu1 }
 0x1e6   :  { %v257_v47 = vpack.c.bf16 %v256_v45, %v256_v45 }
 0x1e8   :  { %1161 = vmatmul.mubr.bf16.vlgmr.msra.gmra.mrb[4].mxu0 %v257_v47 }
 0x1e9   :  { %1200 = vmatprep.mubr.msk.bf16.mxu0 %vm1361_vm0, %v1360_v0  ;;  %1185 = vmatpush3.bf16.msra.mxu0 %v1301_v50  ;;  %v1332_v50 = vld [vmem:[#allocation2 + $0x1f8] sm:$0xff]  }
 0x1ea   :  { %1186 = vmatprep.subr.bf16.mxu0 %v1360_v0 }
 0x1ed   :  { %1187 = vmatpush3.bf16.msra.mxu0 %v1302_v51  ;;  %v1013_v51 = vld [vmem:[%s1506_s2 + $0x6] ss:$0 sm:$0xff] }
 0x1ee   :  { %1188 = vmatprep.subr.bf16.mxu0 %v1360_v0 }
 0x1f1   :  { %1189 = vmatpush3.bf16.msra.mxu0 %v1303_v52 }
 0x1f2   :  { %1190 = vmatprep.subr.bf16.mxu0 %v1360_v0 }
 0x1f5   :  { %1191 = vmatpush3.bf16.msra.mxu0 %v1304_v53 }
 0x1f6   :  { %1192 = vmatprep.subr.bf16.mxu0 %v1360_v0 }
 0x1f9   :  { %1193 = vmatpush3.bf16.msra.mxu0 %v1305_v54 }
 0x1fa   :  { %1194 = vmatprep.subr.bf16.mxu0 %v1360_v0 }
 0x1fd   :  { %1195 = vmatpush3.bf16.msra.mxu0 %v1306_v55 }
 0x1fe   :  { %1196 = vmatprep.subr.bf16.mxu0 %v1360_v0 }
 0x201   :  { %1197 = vmatpush3.bf16.msra.mxu0 %v1307_v1 }
 0x202   :  { %1198 = vmatprep.subr.bf16.mxu0 %v1360_v0 }
 0x205   :  { %1199 = vmatpush3.bf16.msra.mxu0 %v1308_v2 }
 0x206   :  { %1224 = vmatprep.subr.bf16.mxu0 %v1360_v0 }
 0x2bb   :  { %v365_v57 = vpop.f32.mrb[4].mxu0 }
 0x2bc   :  { %v366_v58 = vadd.f32 %v973_v56, %v365_v57  ;;  %v1162_v59 = vpop.f32.mrb[5].mxu0 }
 0x2bd   :  { %v368_v60 = vpop.f32.mrb[6].mxu0  ;;  %v1023_v59 = vld [vmem:[%s1506_s2 + $0x7] ss:$0 sm:$0xff] }
 0x2be   :  { %v371_v61 = vmax.f32 %v366_v58, 0.0  ;;  %v1163_v62 = vpop.f32.mrb[7].mxu0 }
 0x2c0   :  { %v372_v63 = vpack.c.bf16 %v371_v61, %v371_v61 }
 0x2c2   :  { %1181 = vmatmul.mubr.bf16.vlgmr.msra.gmra.mrb[4].mxu1 %v372_v63 }
 0x2c3   :  { %1220 = vmatprep.mubr.msk.bf16.mxu1 %vm1361_vm0, %v1360_v0  ;;  %1205 = vmatpush3.bf16.msra.mxu1 %v1309_v3 }
 0x2c4   :  { %1206 = vmatprep.subr.bf16.mxu1 %v1360_v0 }
 0x2c7   :  { %1207 = vmatpush3.bf16.msra.mxu1 %v1310_v4 }
 0x2c8   :  { %1208 = vmatprep.subr.bf16.mxu1 %v1360_v0 }
 0x2cb   :  { %1209 = vmatpush3.bf16.msra.mxu1 %v1311_v5 }
 0x2cc   :  { %1210 = vmatprep.subr.bf16.mxu1 %v1360_v0 }
 0x2cf   :  { %1211 = vmatpush3.bf16.msra.mxu1 %v1312_v6 }
 0x2d0   :  { %1212 = vmatprep.subr.bf16.mxu1 %v1360_v0 }
 0x2d3   :  { %1213 = vmatpush3.bf16.msra.mxu1 %v1313_v7 }
 0x2d4   :  { %1214 = vmatprep.subr.bf16.mxu1 %v1360_v0 }
 0x2d7   :  { %1215 = vmatpush3.bf16.msra.mxu1 %v1314_v8 }
 0x2d8   :  { %1216 = vmatprep.subr.bf16.mxu1 %v1360_v0 }
 0x2db   :  { %1217 = vmatpush3.bf16.msra.mxu1 %v1315_v17 }
 0x2dc   :  { %1218 = vmatprep.subr.bf16.mxu1 %v1360_v0 }
 0x2df   :  { %1219 = vmatpush3.bf16.msra.mxu1 %v1316_v18 }
 0x2e0   :  { %1244 = vmatprep.subr.bf16.mxu1 %v1360_v0 }
 0x395   :  { %v480_v10 = vpop.f32.mrb[4].mxu1 }
 0x396   :  { %v481_v11 = vadd.f32 %v983_v9, %v480_v10  ;;  %v1182_v12 = vpop.f32.mrb[5].mxu1 }
 0x397   :  { %v483_v13 = vpop.f32.mrb[6].mxu1 }
 0x398   :  { %v486_v14 = vmax.f32 %v481_v11, 0.0  ;;  %v1183_v15 = vpop.f32.mrb[7].mxu1 }
 0x39a   :  { %v487_v16 = vpack.c.bf16 %v486_v14, %v486_v14 }
 0x39c   :  { %1201 = vmatmul.mubr.bf16.vlgmr.msra.gmra.mrb[8].mxu0 %v487_v16 }
 0x39d   :  { %1240 = vmatprep.mubr.msk.bf16.mxu0 %vm1361_vm0, %v1360_v0  ;;  %1225 = vmatpush3.bf16.msra.mxu0 %v1317_v19 }
 0x39e   :  { %1226 = vmatprep.subr.bf16.mxu0 %v1360_v0 }
 0x3a1   :  { %1227 = vmatpush3.bf16.msra.mxu0 %v1318_v20 }
 0x3a2   :  { %1228 = vmatprep.subr.bf16.mxu0 %v1360_v0 }
 0x3a5   :  { %1229 = vmatpush3.bf16.msra.mxu0 %v1319_v21 }
 0x3a6   :  { %1230 = vmatprep.subr.bf16.mxu0 %v1360_v0 }
 0x3a9   :  { %1231 = vmatpush3.bf16.msra.mxu0 %v1320_v22 }
 0x3aa   :  { %1232 = vmatprep.subr.bf16.mxu0 %v1360_v0 }
 0x3ad   :  { %1233 = vmatpush3.bf16.msra.mxu0 %v1321_v23 }
 0x3ae   :  { %1234 = vmatprep.subr.bf16.mxu0 %v1360_v0 }
 0x3b1   :  { %1235 = vmatpush3.bf16.msra.mxu0 %v1322_v24 }
 0x3b2   :  { %1236 = vmatprep.subr.bf16.mxu0 %v1360_v0 }
 0x3b5   :  { %1237 = vmatpush3.bf16.msra.mxu0 %v1323_v33 }
 0x3b6   :  { %1238 = vmatprep.subr.bf16.mxu0 %v1360_v0 }
 0x3b9   :  { %1239 = vmatpush3.bf16.msra.mxu0 %v1324_v34 }
 0x46f   :  { %v595_v26 = vpop.f32.mrb[8].mxu0 }
 0x470   :  { %v596_v27 = vadd.f32 %v993_v25, %v595_v26  ;;  %v1202_v28 = vpop.f32.mrb[9].mxu0 }
 0x471   :  { %v598_v29 = vpop.f32.mrb[10].mxu0 }
 0x472   :  { %v601_v30 = vmax.f32 %v596_v27, 0.0  ;;  %v1203_v31 = vpop.f32.mrb[11].mxu0 }
 0x474   :  { %v602_v32 = vpack.c.bf16 %v601_v30, %v601_v30 }
 0x476   :  { %1221 = vmatmul.mubr.bf16.vlgmr.msra.gmra.mrb[8].mxu1 %v602_v32 }
 0x477   :  { %1260 = vmatprep.mubr.msk.bf16.mxu1 %vm1361_vm0, %v1360_v0  ;;  %1245 = vmatpush3.bf16.msra.mxu1 %v1325_v35 }
 0x478   :  { %1246 = vmatprep.subr.bf16.mxu1 %v1360_v0 }
 0x47b   :  { %1247 = vmatpush3.bf16.msra.mxu1 %v1326_v36 }
 0x47c   :  { %1248 = vmatprep.subr.bf16.mxu1 %v1360_v0 }
 0x47f   :  { %1249 = vmatpush3.bf16.msra.mxu1 %v1327_v37 }
 0x480   :  { %1250 = vmatprep.subr.bf16.mxu1 %v1360_v0 }
 0x483   :  { %1251 = vmatpush3.bf16.msra.mxu1 %v1328_v38 }
 0x484   :  { %1252 = vmatprep.subr.bf16.mxu1 %v1360_v0 }
 0x487   :  { %1253 = vmatpush3.bf16.msra.mxu1 %v1329_v39 }
 0x488   :  { %1254 = vmatprep.subr.bf16.mxu1 %v1360_v0 }
 0x48b   :  { %1255 = vmatpush3.bf16.msra.mxu1 %v1330_v40 }
 0x48c   :  { %1256 = vmatprep.subr.bf16.mxu1 %v1360_v0 }
 0x48f   :  { %1257 = vmatpush3.bf16.msra.mxu1 %v1331_v49 }
 0x490   :  { %1258 = vmatprep.subr.bf16.mxu1 %v1360_v0 }
 0x493   :  { %1259 = vmatpush3.bf16.msra.mxu1 %v1332_v50 }
 0x549   :  { %v710_v42 = vpop.f32.mrb[8].mxu1 }
 0x54a   :  { %v711_v43 = vadd.f32 %v1003_v41, %v710_v42  ;;  %v1222_v44 = vpop.f32.mrb[9].mxu1 }
 0x54b   :  { %v713_v45 = vpop.f32.mrb[10].mxu1 }
 0x54c   :  { %v716_v46 = vmax.f32 %v711_v43, 0.0  ;;  %v1223_v47 = vpop.f32.mrb[11].mxu1 }
 0x54e   :  { %v717_v48 = vpack.c.bf16 %v716_v46, %v716_v46 }
 0x550   :  { %1241 = vmatmul.mubr.bf16.vlgmr.msra.gmra.mrb[12].mxu0 %v717_v48 }
 0x623   :  { %v825_v52 = vpop.f32.mrb[12].mxu0 }
 0x624   :  { %v826_v53 = vadd.f32 %v1013_v51, %v825_v52  ;;  %v1242_v54 = vpop.f32.mrb[13].mxu0 }
 0x625   :  { %v828_v55 = vpop.f32.mrb[14].mxu0 }
 0x626   :  { %v831_v56 = vmax.f32 %v826_v53, 0.0  ;;  %v1243_v57 = vpop.f32.mrb[15].mxu0 }
 0x628   :  { %v832_v58 = vpack.c.bf16 %v831_v56, %v831_v56 }
 0x62a   :  { %1261 = vmatmul.mubr.bf16.vlgmr.msra.gmra.mrb[12].mxu1 %v832_v58 }
 0x6fd   :  { %v940_v60 = vpop.f32.mrb[12].mxu1 }
 0x6fe   :  { %v941_v0 = vadd.f32 %v1023_v59, %v940_v60  ;;  %v1262_v61 = vpop.f32.mrb[13].mxu1 }
 0x6ff   :  { %v943_v62 = vpop.f32.mrb[14].mxu1 }
 0x700   :  { %v946_v63 = vmax.f32 %v941_v0, 0.0  ;;  %v1263_v1 = vpop.f32.mrb[15].mxu1 }
 0x702   :  { %947 = vst [vmem:[%s1507_s3] sm:$0xff] %v946_v63 }
 0x703   :  { %952 = vsyncpa [#allocation3], 1 }

</bundles_post_ra>
